<compile_context>
chip_gen: v7x
topology: tpu7x:2x2x1
jax: 0.10.0
libtpu: 0.0.40
codegen_flags: <defaults>
</compile_context>

<pallas_src>
import functools

import jax
import jax.numpy as jnp
from jax.experimental import pallas as pl
from jax.experimental.pallas import tpu as pltpu


_ONEHOT_VOCAB_LIMIT = 2048  # above this, use a VMEM gather instead of one-hot @ table


def _round_up(n, m):
    return -(-n // m) * m


def _step_vmem_bytes(bt, L, V, C, Op, Np, use_onehot):
    """Rough f32 footprint of the per-step intermediates (for sizing only)."""
    rows = bt * L
    b = rows * C * 4                 # embedded activations x
    b += 2 * rows * 3 * Op * 4       # fused conv output + shift / sum temporaries
    b += bt * Np * 4                 # output block
    if use_onehot:
        b += 2 * rows * V * 4        # iota + one-hot
    return b


def _choose_block_b(B, L, V, C, Op, Np, use_onehot):
    """Batch rows per grid step."""
    def r8(n):
        return max(8, -(-n // 8) * 8)

    # ~2048 LHS rows per step amortizes the ~0.35us per-step overhead (plenty of VMEM
    # headroom on the 128 MiB parts; the budget below caps it where there isn't).
    bt = r8(-(-2048 // L))
    # v7x has 2 TensorCores: keep >= 2 steps on the 'parallel' grid axis when the
    # batch is large enough to split (harmless on the single-core parts).
    if B >= 16:
        bt = min(bt, r8(-(-B // 2)))
    # Cap by a VMEM budget for the per-step intermediates (stays well under the 32 MiB
    # scoped default, so it also fits v7x's 64 MiB part with double-buffering).
    budget = 24 * 2 ** 20
    while bt > 8 and _step_vmem_bytes(bt, L, V, C, Op, Np, use_onehot) > budget:
        bt -= 8
    return B if B <= bt else bt


def _encoder_kernel(ix_ref, emb_ref, wcat_ref, bconv_ref, wdense_ref, bdense_ref,
                    out_ref, *, block_b, seq_len, vocab, o_pad, use_onehot):
    """One grid step processes `block_b` batch rows.

    ix_ref     : [Bt, L]       int32 token ids
    emb_ref    : [V, C]        f32 embedding table (padding_idx row is zero)
    wcat_ref   : [C, 3*Op]     fused conv taps; tap k occupies lanes [k*Op : k*Op + O]
    bconv_ref  : [1, Op]       conv bias (zero-padded)
    wdense_ref : [Op, Np]      dense weight (zero-padded to 128 output lanes)
    bdense_ref : [1, Np]       dense bias  (zero-padded)
    out_ref    : [Bt, Np]      lane-dense output block; real outputs live in lanes [:6]
    """
    Bt, L, V, Op = block_b, seq_len, vocab, o_pad
    rows = Bt * L
    idx = ix_ref[...]                                                # [Bt, L] int32

    # ---- Embedding lookup -> x: [rows, C] -----------------------------------
    if use_onehot:
        # Small vocab: fuse the gather as a one-hot matmul on the MXU.
        # padding_idx semantics come for free (that table row is zero); out-of-range
        # ids silently embed to zero instead of erroring like nn.Embedding.
        iota_v = jax.lax.broadcasted_iota(jnp.int32, (Bt, L, V), 2)
        onehot = (iota_v == idx[:, :, None]).astype(jnp.float32)    # [Bt, L, V]
        x = jnp.dot(onehot.reshape(rows, V), emb_ref[...],
                    preferred_element_type=jnp.float32)             # [rows, C]
    else:
        # Large vocab: VMEM row gather, O(rows*C) instead of O(rows*V).
        # TODO(synk): for vocabularies too large for VMEM residency, switch to a
        # scalar-prefetch / manual-DMA gather of embedding rows from HBM.
        x = jnp.take(emb_ref[...], idx.reshape(rows), axis=0)       # [rows, C]

    # ---- Conv1d(k=3, pad=1): one fused lane-dense matmul, taps in 128-lane slots.
    # TODO(synk): on v6e/v7x, bf16 MXU inputs would halve the big intermediates but
    # break the f32 reference tolerance; kept in f32.
    y = jnp.dot(x, wcat_ref[...], preferred_element_type=jnp.float32)  # [rows, 3*Op]
    y0 = y[:, 0 * Op:1 * Op]      # x[t] @ W[:,:,0]  -> contributes to conv[t+1]
    y1 = y[:, 1 * Op:2 * Op]      # x[t] @ W[:,:,1]  -> contributes to conv[t]
    y2 = y[:, 2 * Op:3 * Op]      # x[t] @ W[:,:,2]  -> contributes to conv[t-1]

    # +-1 time shifts via circular sublane rolls (XLU slot) + boundary masks (VPU).
    # Wrap-around / cross-sequence rows are exactly the masked boundary rows.
    left = pltpu.roll(y0, shift=1, axis=0)                # left[r]  = y0[r-1]
    right = pltpu.roll(y2, shift=rows - 1, axis=0)        # right[r] = y2[r+1]
    t_pos = jax.lax.broadcasted_iota(jnp.int32, (rows, Op), 0) % L
    left = jnp.where(t_pos == 0, 0.0, left)
    right = jnp.where(t_pos == L - 1, 0.0, right)
    conv = left + y1 + right                              # [rows, Op], bias deferred

    # ---- Global max over time; conv bias after the max (constant over time); ReLU.
    pooled = jnp.max(conv.reshape(Bt, L, Op), axis=1)     # [Bt, Op]
    h = jnp.maximum(pooled + bconv_ref[...], 0.0)

    # ---- Dense -> lane-dense [Bt, Np] block ----------------------------------
    out = jnp.dot(h, wdense_ref[...], preferred_element_type=jnp.float32)
    out_ref[...] = (out + bdense_ref[...]).astype(out_ref.dtype)


def comments_encoder_forward(text_ix, params, block_b=None):
    """text_ix: int32/int64 [B, L]; returns float32 [B, 6]."""
    emb = params["emb"].astype(jnp.float32)          # [V, C]
    wconv = params["wconv"].astype(jnp.float32)      # [3, C, O]
    bconv = params["bconv"].astype(jnp.float32)      # [1, O]
    wdense = params["wdense"].astype(jnp.float32)    # [O, N]
    bdense = params["bdense"].astype(jnp.float32)    # [1, N]

    B, L = text_ix.shape
    V, C = emb.shape
    O = wconv.shape[2]
    N = wdense.shape[1]
    Op = _round_up(O, 128)
    Np = _round_up(N, 128)

    use_onehot = V <= _ONEHOT_VOCAB_LIMIT

    # Fused, lane-dense conv RHS: tap k lives in lanes [k*Op : k*Op + O].
    wcat = jnp.zeros((C, 3 * Op), jnp.float32)
    for k in range(3):
        wcat = wcat.at[:, k * Op:k * Op + O].set(wconv[k])
    bconv_p = jnp.zeros((1, Op), jnp.float32).at[:, :O].set(bconv)
    wdense_p = jnp.zeros((Op, Np), jnp.float32).at[:O, :N].set(wdense)
    bdense_p = jnp.zeros((1, Np), jnp.float32).at[:, :N].set(bdense)

    Bt = _choose_block_b(B, L, V, C, Op, Np, use_onehot) if block_b is None else block_b
    Bp = pl.cdiv(B, Bt) * Bt

    ix = text_ix.astype(jnp.int32)
    if Bp != B:
        # Pad with token 0; padded rows compute garbage that is sliced off below.
        ix = jnp.pad(ix, ((0, Bp - B), (0, 0)))

    # Explicit VMEM budget (constants are double-buffered by the pipeline).
    # TODO(synk): single-buffer the constant weight blocks (pipeline_mode=pl.Buffered(1))
    # to halve their footprint on v7x's 64 MiB VMEM.
    const_bytes = (V * C + C * 3 * Op + Op + Op * Np + Np) * 4
    dyn_bytes = _step_vmem_bytes(Bt, L, V, C, Op, Np, use_onehot)
    try:
        vmem_cap = pltpu.get_tpu_info().vmem_capacity_bytes
    except Exception:
        vmem_cap = 64 * 2 ** 20          # conservative fallback (v7x per-core VMEM)
    vmem_limit = int(min(max(2 * (dyn_bytes + 2 * const_bytes), 32 * 2 ** 20),
                         int(0.75 * vmem_cap)))

    kernel = functools.partial(_encoder_kernel, block_b=Bt, seq_len=L, vocab=V,
                               o_pad=Op, use_onehot=use_onehot)

    out = pl.pallas_call(
        kernel,
        out_shape=jax.ShapeDtypeStruct((Bp, Np), jnp.float32),
        grid_spec=pltpu.PrefetchScalarGridSpec(
            num_scalar_prefetch=0,
            grid=(Bp // Bt,),
            in_specs=[
                pl.BlockSpec((Bt, L), lambda b: (b, 0)),          # token ids
                pl.BlockSpec((V, C), lambda b: (0, 0)),           # embedding table (resident)
                pl.BlockSpec((C, 3 * Op), lambda b: (0, 0)),      # fused conv taps (resident)
                pl.BlockSpec((1, Op), lambda b: (0, 0)),          # conv bias
                pl.BlockSpec((Op, Np), lambda b: (0, 0)),         # dense weight (padded)
                pl.BlockSpec((1, Np), lambda b: (0, 0)),          # dense bias (padded)
            ],
            out_specs=pl.BlockSpec((Bt, Np), lambda b: (b, 0)),   # lane-dense output
        ),
        compiler_params=pltpu.CompilerParams(
            dimension_semantics=("parallel",),
            vmem_limit_bytes=vmem_limit),
    )(ix, emb, wcat, bconv_p, wdense_p, bdense_p)

    return out[:B, :N]


def _reference_forward(text_ix, params):
    """Pure-JAX reference mirroring the PyTorch forward."""
    emb_table = params["emb"]
    h = jnp.take(emb_table, text_ix.astype(jnp.int32), axis=0)      # [B, L, C]
    h_pad = jnp.pad(h, ((0, 0), (1, 1), (0, 0)))
    L = text_ix.shape[1]
    conv = (h_pad[:, 0:L, :] @ params["wconv"][0]
            + h_pad[:, 1:L + 1, :] @ params["wconv"][1]
            + h_pad[:, 2:L + 2, :] @ params["wconv"][2]
            + params["bconv"][None, :, :])                          # [B, L, O]
    pooled = jnp.max(conv, axis=1)                                  # [B, O]
    h = jnp.maximum(pooled, 0.0)
    return h @ params["wdense"] + params["bdense"]                  # [B, 6]


def make_params(n_tokens, pad_ix, out_size=64, emb_dim=64, seed=0):
    keys = jax.random.split(jax.random.PRNGKey(seed), 5)
    emb = 0.1 * jax.random.normal(keys[0], (n_tokens, emb_dim), jnp.float32)
    emb = emb.at[pad_ix].set(0.0)                                   # padding_idx row = 0
    wconv = 0.1 * jax.random.normal(keys[1], (3, emb_dim, out_size), jnp.float32)
    bconv = 0.1 * jax.random.normal(keys[2], (1, out_size), jnp.float32)
    wdense = 0.1 * jax.random.normal(keys[3], (out_size, 6), jnp.float32)
    bdense = 0.1 * jax.random.normal(keys[4], (1, 6), jnp.float32)
    return dict(emb=emb, wconv=wconv, bconv=bconv, wdense=wdense, bdense=bdense)


if __name__ == "__main__":
    n_tokens, PAD_IX, out_size = 50, 0, 64
    B, L = 2, 8

    params = make_params(n_tokens, PAD_IX, out_size=out_size)
    text_ix = jax.random.randint(jax.random.PRNGKey(0), (B, L), 0, n_tokens,
                                 dtype=jnp.int32)

    out = comments_encoder_forward(text_ix, params)
    out = jax.block_until_ready(out)

    ref = _reference_forward(text_ix, params)
    assert out.shape == (B, 6) and out.dtype == jnp.float32
    assert jnp.allclose(out, ref, atol=1e-4, rtol=1e-4)
    print("KERNEL_OK")
</pallas_src>

<mosaic_0001>
module attributes {stable_mosaic.version = 11 : i64} {
  func.func @_encoder_kernel(%arg0: i32, %arg1: memref<2x8xi32, #tpu.memory_space<vmem>>, %arg2: memref<50x64xf32, #tpu.memory_space<vmem>>, %arg3: memref<64x384xf32, #tpu.memory_space<vmem>>, %arg4: memref<1x128xf32, #tpu.memory_space<vmem>>, %arg5: memref<128x128xf32, #tpu.memory_space<vmem>>, %arg6: memref<1x128xf32, #tpu.memory_space<vmem>>, %arg7: memref<2x128xf32, #tpu.memory_space<vmem>>) attributes {dimension_semantics = [#tpu.dimension_semantics<parallel>], iteration_bounds = array<i64: 1>, scalar_prefetch = 0 : i64, scratch_operands = 0 : i64, tpu.core_type = #tpu.core_type<tc>, window_params = [{transform_indices = @transform_0, window_bounds = array<i64: 2, 8>}, {pipeline_mode = #tpu.pipeline_mode<synchronous>, transform_indices = @transform_1, window_bounds = array<i64: 50, 64>}, {pipeline_mode = #tpu.pipeline_mode<synchronous>, transform_indices = @transform_2, window_bounds = array<i64: 64, 384>}, {pipeline_mode = #tpu.pipeline_mode<synchronous>, transform_indices = @transform_3, window_bounds = array<i64: 1, 128>}, {pipeline_mode = #tpu.pipeline_mode<synchronous>, transform_indices = @transform_4, window_bounds = array<i64: 128, 128>}, {pipeline_mode = #tpu.pipeline_mode<synchronous>, transform_indices = @transform_5, window_bounds = array<i64: 1, 128>}, {transform_indices = @transform_6, window_bounds = array<i64: 2, 128>}]} {
    %c0 = arith.constant 0 : index
    %c0_0 = arith.constant 0 : index
    %0 = vector.load %arg1[%c0, %c0_0] : memref<2x8xi32, #tpu.memory_space<vmem>>, vector<2x8xi32>
    %1 = tpu.iota {dimensions = array<i32: 2>} : vector<2x8x50xi32>
    %2 = vector.shape_cast %0 : vector<2x8xi32> to vector<2x8x1xi32>
    %3 = vector.broadcast %2 : vector<2x8x1xi32> to vector<2x8x50xi32>
    %4 = arith.cmpi eq, %1, %3 : vector<2x8x50xi32>
    %5 = arith.extui %4 : vector<2x8x50xi1> to vector<2x8x50xi32>
    %6 = arith.sitofp %5 : vector<2x8x50xi32> to vector<2x8x50xf32>
    %7 = vector.shape_cast %6 : vector<2x8x50xf32> to vector<16x50xf32>
    %c0_1 = arith.constant 0 : index
    %c0_2 = arith.constant 0 : index
    %8 = vector.load %arg2[%c0_1, %c0_2] : memref<50x64xf32, #tpu.memory_space<vmem>>, vector<50x64xf32>
    %cst = arith.constant dense<0.000000e+00> : vector<16x64xf32>
    %9 = tpu.matmul %7, %8, %cst {dimension_numbers = #tpu.dot_dimension_numbers<[1], [0], [0], [1], [0, 0, 1, 1], [], []>} : vector<16x50xf32>, vector<50x64xf32>, vector<16x64xf32> -> vector<16x64xf32>
    %c0_3 = arith.constant 0 : index
    %c0_4 = arith.constant 0 : index
    %10 = vector.load %arg3[%c0_3, %c0_4] : memref<64x384xf32, #tpu.memory_space<vmem>>, vector<64x384xf32>
    %cst_5 = arith.constant dense<0.000000e+00> : vector<16x384xf32>
    %11 = tpu.matmul %9, %10, %cst_5 {dimension_numbers = #tpu.dot_dimension_numbers<[1], [0], [0], [1], [0, 0, 1, 1], [], []>} : vector<16x64xf32>, vector<64x384xf32>, vector<16x384xf32> -> vector<16x384xf32>
    %12 = vector.extract_strided_slice %11 {offsets = [0, 0], sizes = [16, 128], strides = [1, 1]} : vector<16x384xf32> to vector<16x128xf32>
    %13 = vector.extract_strided_slice %11 {offsets = [0, 128], sizes = [16, 128], strides = [1, 1]} : vector<16x384xf32> to vector<16x128xf32>
    %14 = vector.extract_strided_slice %11 {offsets = [0, 256], sizes = [16, 128], strides = [1, 1]} : vector<16x384xf32> to vector<16x128xf32>
    %c1_i32 = arith.constant 1 : i32
    %15 = tpu.dynamic_rotate %12 by %c1_i32 dim 0 : vector<16x128xf32>, i32 -> vector<16x128xf32>
    %c15_i32 = arith.constant 15 : i32
    %16 = tpu.dynamic_rotate %14 by %c15_i32 dim 0 : vector<16x128xf32>, i32 -> vector<16x128xf32>
    %17 = tpu.iota {dimensions = array<i32: 0>} : vector<16x128xi32>
    %c8_i32 = arith.constant 8 : i32
    %c0_i32 = arith.constant 0 : i32
    %18 = arith.cmpi eq, %c8_i32, %c0_i32 : i32
    %c1_i32_6 = arith.constant 1 : i32
    %19 = arith.select %18, %c1_i32_6, %c8_i32 : i32
    %20 = vector.broadcast %19 : i32 to vector<16x128xi32>
    %21 = arith.remsi %17, %20 : vector<16x128xi32>
    %c0_i32_7 = arith.constant 0 : i32
    %22 = vector.broadcast %c0_i32_7 : i32 to vector<16x128xi32>
    %23 = arith.cmpi ne, %21, %22 : vector<16x128xi32>
    %c0_i32_8 = arith.constant 0 : i32
    %24 = vector.broadcast %c0_i32_8 : i32 to vector<16x128xi32>
    %25 = arith.cmpi slt, %21, %24 : vector<16x128xi32>
    %c0_i32_9 = arith.constant 0 : i32
    %26 = arith.cmpi slt, %19, %c0_i32_9 : i32
    %27 = vector.broadcast %26 : i1 to vector<16x128xi1>
    %28 = vector.broadcast %27 : vector<16x128xi1> to vector<16x128xi1>
    %29 = arith.xori %25, %28 : vector<16x128xi1>
    %30 = arith.andi %29, %23 : vector<16x128xi1>
    %31 = vector.broadcast %19 : i32 to vector<16x128xi32>
    %32 = arith.addi %21, %31 : vector<16x128xi32>
    %33 = arith.select %30, %32, %21 : vector<16x128xi1>, vector<16x128xi32>
    %c0_i32_10 = arith.constant 0 : i32
    %34 = vector.broadcast %c0_i32_10 : i32 to vector<16x128xi32>
    %35 = arith.cmpi eq, %33, %34 : vector<16x128xi32>
    %cst_11 = arith.constant 0.000000e+00 : f32
    %36 = vector.broadcast %cst_11 : f32 to vector<16x128xf32>
    %37 = arith.select %35, %36, %15 : vector<16x128xi1>, vector<16x128xf32>
    %c7_i32 = arith.constant 7 : i32
    %38 = vector.broadcast %c7_i32 : i32 to vector<16x128xi32>
    %39 = arith.cmpi eq, %33, %38 : vector<16x128xi32>
    %cst_12 = arith.constant 0.000000e+00 : f32
    %40 = vector.broadcast %cst_12 : f32 to vector<16x128xf32>
    %41 = arith.select %39, %40, %16 : vector<16x128xi1>, vector<16x128xf32>
    %42 = arith.addf %37, %13 : vector<16x128xf32>
    %43 = arith.addf %42, %41 : vector<16x128xf32>
    %44 = vector.shape_cast %43 : vector<16x128xf32> to vector<2x8x128xf32>
    %cst_13 = arith.constant dense<0xFF800000> : vector<2x128xf32>
    %45 = vector.multi_reduction <maximumf>, %44, %cst_13 [1] : vector<2x8x128xf32> to vector<2x128xf32>
    %c0_14 = arith.constant 0 : index
    %c0_15 = arith.constant 0 : index
    %46 = vector.load %arg4[%c0_14, %c0_15] : memref<1x128xf32, #tpu.memory_space<vmem>>, vector<1x128xf32>
    %47 = vector.broadcast %46 : vector<1x128xf32> to vector<2x128xf32>
    %48 = arith.addf %45, %47 : vector<2x128xf32>
    %cst_16 = arith.constant 0.000000e+00 : f32
    %49 = vector.broadcast %cst_16 : f32 to vector<2x128xf32>
    %50 = arith.maximumf %48, %49 : vector<2x128xf32>
    %c0_17 = arith.constant 0 : index
    %c0_18 = arith.constant 0 : index
    %51 = vector.load %arg5[%c0_17, %c0_18] : memref<128x128xf32, #tpu.memory_space<vmem>>, vector<128x128xf32>
    %cst_19 = arith.constant dense<0.000000e+00> : vector<2x128xf32>
    %52 = tpu.matmul %50, %51, %cst_19 {dimension_numbers = #tpu.dot_dimension_numbers<[1], [0], [0], [1], [0, 0, 1, 1], [], []>} : vector<2x128xf32>, vector<128x128xf32>, vector<2x128xf32> -> vector<2x128xf32>
    %c0_20 = arith.constant 0 : index
    %c0_21 = arith.constant 0 : index
    %53 = vector.load %arg6[%c0_20, %c0_21] : memref<1x128xf32, #tpu.memory_space<vmem>>, vector<1x128xf32>
    %54 = vector.broadcast %53 : vector<1x128xf32> to vector<2x128xf32>
    %55 = arith.addf %52, %54 : vector<2x128xf32>
    %c0_22 = arith.constant 0 : index
    %c0_23 = arith.constant 0 : index
    %56 = vector.load %arg7[%c0_22, %c0_23] : memref<2x128xf32, #tpu.memory_space<vmem>>, vector<2x128xf32>
    tpu.vector_store %arg7[%c0_22, %c0_23], %55 {strides = array<i32>} : memref<2x128xf32, #tpu.memory_space<vmem>>, vector<2x128xf32>,
    return
  }
  func.func @transform_0(%arg0: i32) -> (i32, i32) {
    %c0_i32 = arith.constant 0 : i32
    %c0_i32_0 = arith.constant 0 : i32
    return %arg0, %c0_i32 : i32, i32
  }
  func.func @transform_1(%arg0: i32) -> (i32, i32) {
    %c0_i32 = arith.constant 0 : i32
    %c0_i32_0 = arith.constant 0 : i32
    %c0_i32_1 = arith.constant 0 : i32
    return %c0_i32, %c0_i32_0 : i32, i32
  }
  func.func @transform_2(%arg0: i32) -> (i32, i32) {
    %c0_i32 = arith.constant 0 : i32
    %c0_i32_0 = arith.constant 0 : i32
    %c0_i32_1 = arith.constant 0 : i32
    return %c0_i32, %c0_i32_0 : i32, i32
  }
  func.func @transform_3(%arg0: i32) -> (i32, i32) {
    %c0_i32 = arith.constant 0 : i32
    %c0_i32_0 = arith.constant 0 : i32
    %c0_i32_1 = arith.constant 0 : i32
    return %c0_i32, %c0_i32_0 : i32, i32
  }
  func.func @transform_4(%arg0: i32) -> (i32, i32) {
    %c0_i32 = arith.constant 0 : i32
    %c0_i32_0 = arith.constant 0 : i32
    %c0_i32_1 = arith.constant 0 : i32
    return %c0_i32, %c0_i32_0 : i32, i32
  }
  func.func @transform_5(%arg0: i32) -> (i32, i32) {
    %c0_i32 = arith.constant 0 : i32
    %c0_i32_0 = arith.constant 0 : i32
    %c0_i32_1 = arith.constant 0 : i32
    return %c0_i32, %c0_i32_0 : i32, i32
  }
  func.func @transform_6(%arg0: i32) -> (i32, i32) {
    %c0_i32 = arith.constant 0 : i32
    %c0_i32_0 = arith.constant 0 : i32
    return %arg0, %c0_i32 : i32, i32
  }
}

</mosaic_0001>

<bundles_post_ra>
// kernel: tpu_custom_call.1
= control target key start
LH: loop header
LB: loop body
LE: loop exit
PB: predicated region body
PF: predicated region fallthrough
CT: control target
= control target key end

     0   :  { %11 = vsyncpa [#allocation3], 0  ;;  %s1019_s0 = inlined_call_operand.hbm [shape: s32[2,8], index: 0, kind: input, shape index: {}]   ;;  %s1020_s1 = inlined_call_operand.hbm [shape: f32[50,64], index: 1, kind: input, shape index: {}]   ;;  %s1021_s2 = inlined_call_operand.hbm [shape: f32[64,384], index: 2, kind: input, shape index: {}]   ;;  %s1022_s3 = inlined_call_operand.vmem [shape: f32[1,128], index: 3, kind: input, shape index: {}]   ;;  %s1023_s4 = inlined_call_operand.hbm [shape: f32[128,128], index: 4, kind: input, shape index: {}]   ;;  %s1024_s5 = inlined_call_operand.vmem [shape: f32[1,128], index: 5, kind: input, shape index: {}]   ;;  %s1025_s6 = inlined_call_operand.hbm [shape: f32[2,128], index: 6, kind: output, shape index: {}]  }
   0x1   :  { %12 = vsyncpa [#allocation6], 0 }
   0x2   :  { %13 = vsyncpa [#allocation9], 0 }
   0x3   :  { %14 = vsyncpa [#allocation4], 0  ;;  %s881_s21 = smov [#allocation5]   ;;  %s763_s25 = scalar_lea.hbm %s1020_s1, 896 }
   0x4   :  { %s30_s22 = sshll.u32 %s881_s21, 4  ;;  %p764_p0 = scmp.ne.s32.totalorder %s1020_s1, %s763_s25  ;;  %s31_s22 = int_to_ptr.vmem [resolvable:$true] %s30_s22 }
   0x5   :  { %p767_p1 = scmp.lt.u32.totalorder %s763_s25, %s1020_s1 }
   0x7   :  { %p769_p2 = pnand %p767_p1, %p764_p0 }
   0x9   :  { %772 = shalt.err (!%p769_p2)
}
   0xa   :  { %s773_s30 = scalar_lea.vmem %s31_s22, 896  ;;  %p778_p4 = scmp.lt.s32.totalorder %s31_s22, %s31_s22 }
   0xb   :  { %p774_p3 = scmp.ne.s32.totalorder %s31_s22, %s773_s30  ;;  %p779_p5 = scmp.lt.s32.totalorder %s773_s30, %s773_s30 }
   0xd   :  { %p780_p6 = por %p779_p5, %p778_p4 }
   0xf   :  { %p781_p7 = pnand %p780_p6, %p774_p3 }
  0x11   :  { %784 = shalt.err (!%p781_p7)
}
  0x12   :  { %s882_s7 = smov 128   ;;  %s883_s8 = smov 8  }
  0x13   :  { %36 = dma.hbm_to_vmem [thread:$0]  %s1020_s1, 896, %s31_s22, [#allocation6], %s882_s7, %s882_s7, %s883_s8  }
  0x14   :  { %s884_s11 = smov [#allocation2]   ;;  %s885_s13 = smov [#allocation7]  }
  0x15   :  { %s21_s12 = sshll.u32 %s884_s11, 4  ;;  %s42_s14 = sshll.u32 %s885_s13, 4  ;;  %s22_s12 = int_to_ptr.vmem [resolvable:$true] %s21_s12  ;;  %s43_s14 = int_to_ptr.vmem [resolvable:$true] %s42_s14 }
  0x16   :  { %s785_s17 = scalar_lea.hbm %s1019_s0, 32 }
  0x17   :  { %p786_p8 = scmp.ne.s32.totalorder %s1019_s0, %s785_s17  ;;  %p789_p9 = scmp.lt.u32.totalorder %s785_s17, %s1019_s0 }
  0x19   :  { %p791_p10 = pnand %p789_p9, %p786_p8 }
  0x1b   :  { %794 = shalt.err (!%p791_p10)
}
  0x1c   :  { %s795_s1 = scalar_lea.vmem %s22_s12, 32  ;;  %p800_p12 = scmp.lt.s32.totalorder %s22_s12, %s22_s12 }
  0x1d   :  { %p796_p11 = scmp.ne.s32.totalorder %s22_s12, %s795_s1  ;;  %p801_p13 = scmp.lt.s32.totalorder %s795_s1, %s795_s1 }
  0x1f   :  { %p802_p0 = por %p801_p13, %p800_p12 }
  0x21   :  { %p803_p1 = pnand %p802_p0, %p796_p11 }
  0x23   :  { %806 = shalt.err (!%p803_p1)
}
  0x24   :  { %24 = dma.hbm_to_vmem [thread:$0]  %s1019_s0, 32, %s22_s12, [#allocation3]  }
  0x25   :  { %s807_s26 = scalar_lea.hbm %s1021_s2, 3072 }
  0x26   :  { %p808_p2 = scmp.ne.s32.totalorder %s1021_s2, %s807_s26  ;;  %p811_p3 = scmp.lt.u32.totalorder %s807_s26, %s1021_s2 }
  0x28   :  { %p813_p4 = pnand %p811_p3, %p808_p2 }
  0x2a   :  { %816 = shalt.err (!%p813_p4)
}
  0x2b   :  { %s817_s9 = scalar_lea.vmem %s43_s14, 3072  ;;  %p822_p6 = scmp.lt.s32.totalorder %s43_s14, %s43_s14 }
  0x2c   :  { %p818_p5 = scmp.ne.s32.totalorder %s43_s14, %s817_s9  ;;  %p823_p7 = scmp.lt.s32.totalorder %s817_s9, %s817_s9 }
  0x2e   :  { %p824_p8 = por %p823_p7, %p822_p6 }
  0x30   :  { %p825_p9 = pnand %p824_p8, %p818_p5 }
  0x32   :  { %828 = shalt.err (!%p825_p9)
}
  0x33   :  { %s886_s0 = smov 384   ;;  %s887_s10 = smov 24  }
  0x34   :  { %48 = dma.hbm_to_vmem [thread:$0]  %s1021_s2, 3072, %s43_s14, [#allocation6], %s886_s0, %s886_s0, %s887_s10  }
  0x35   :  { %s888_s13 = smov [#allocation8]   ;;  %s829_s18 = scalar_lea.hbm %s1023_s4, 2048 }
  0x36   :  { %s56_s15 = sshll.u32 %s888_s13, 4  ;;  %p830_p10 = scmp.ne.s32.totalorder %s1023_s4, %s829_s18  ;;  %s57_s15 = int_to_ptr.vmem [resolvable:$true] %s56_s15 }
  0x37   :  { %p833_p11 = scmp.lt.u32.totalorder %s829_s18, %s1023_s4 }
  0x39   :  { %p835_p12 = pnand %p833_p11, %p830_p10 }
  0x3b   :  { %838 = shalt.err (!%p835_p12)
}
  0x3c   :  { %s839_s22 = scalar_lea.vmem %s57_s15, 2048  ;;  %p844_p0 = scmp.lt.s32.totalorder %s57_s15, %s57_s15 }
  0x3d   :  { %p840_p13 = scmp.ne.s32.totalorder %s57_s15, %s839_s22  ;;  %p845_p1 = scmp.lt.s32.totalorder %s839_s22, %s839_s22 }
  0x3f   :  { %p846_p2 = por %p845_p1, %p844_p0 }
  0x41   :  { %p847_p3 = pnand %p846_p2, %p840_p13 }
  0x43   :  { %850 = shalt.err (!%p847_p3)
}
  0x44   :  { %62 = dma.hbm_to_vmem [thread:$0]  %s1023_s4, 2048, %s57_s15, [#allocation9], %s882_s7, %s882_s7, %s883_s8  }
  0x45   :  { %873 = dma.done.wait [#allocation3], 32  }
  0x46   :  { %874 = vsyncadd [#allocation3], 4294967264 }
  0x47   :  { %875 = dma.done.wait [#allocation6], 3968  }
  0x48   :  { %876 = vsyncadd [#allocation6], 4294963328 }
  0x49   :  { %877 = dma.done.wait [#allocation9], 2048  }
  0x4a   :  { %878 = vsyncadd [#allocation9], 4294965248  ;;  %v78_v0 = vlaneseq  ;;  %v77_v4 = vld [vmem:[#allocation2] sm:$0x3]  ;;  %v100_v5 = vld [vmem:[#allocation5] sm:$0xff]  ;;  %vm114_vm0 = vcmask 1041408  }
  0x4b   :  { %v101_v6 = vld [vmem:[#allocation5 + $0x8] sm:$0xff]  ;;  %v102_v9 = vld [vmem:[#allocation5 + $0x10] sm:$0xff]  ;;  %v103_v10 = vld [vmem:[#allocation5 + $0x18] sm:$0xff]  ;;  %vm107_vm1 = vcmask 408576   ;;  %v889_v24 = vmov 0.0   ;;  %vm217_vm4 = vcmask 523264  }
  0x4c   :  { %v982_v1 = vshrl.u32 %v78_v0, 7  ;;  %v683_v8 = vpack.c.bf16 %v101_v6, %v100_v5  ;;  %v687_v11 = vpack.c.bf16 %v103_v10, %v102_v9  ;;  %v104_v12 = vld [vmem:[#allocation5 + $0x20] sm:$0xff]  ;;  %v105_v13 = vld [vmem:[#allocation5 + $0x28] sm:$0xff]  ;;  %v106_v16 = vld [vmem:[#allocation5 + $0x30] sm:$0x3]  ;;  %v79_v20 = vand.u32 127, %v78_v0 }
  0x4d   :  { %v691_v15 = vpack.c.bf16 %v105_v13, %v104_v12  ;;  %v194_v17 = vld [vmem:[#allocation7 + $0x8] sm:$0xff]  ;;  %v197_v18 = vld [vmem:[#allocation7 + $0x20] sm:$0xff]  ;;  %v196_v23 = vld [vmem:[#allocation7 + $0x18] sm:$0xff]  ;;  %v890_v63 = vmov 0.0|0.0   ;;  %vm891_vm5 = vmmov 0   ;;  %vm474_vm12 = vcmask 1041409  }
  0x4e   :  { %v82_v2 = vsub.s32 0, %v982_v1  ;;  %v89_v3 = vsub.s32 1, %v982_v1  ;;  %684 = vmatprep.subr.bf16.mxu0 %v683_v8  ;;  %v695_v19 = vpack.c.bf16 %v197_v18, %v194_v17  ;;  %v193_v22 = vld [vmem:[#allocation7] sm:$0xff]  ;;  %v200_v26 = vld [vmem:[#allocation7 + $0x38] sm:$0xff]  ;;  %v203_v27 = vld [vmem:[#allocation7 + $0x50] sm:$0xff]  ;;  %727 = vmatprep.subr.bf16.mxu1 %v890_v63  ;;  %vm380_vm6 = vcmp.lt.s32.totalorder %v982_v1, 1 }
  0x4f   :  { %686 = vmatpush3.bf16.msra.mxu0 %v683_v8  ;;  %v697_v29 = vpack.c.bf16 %v196_v23, %v193_v22  ;;  %v699_v30 = vpack.c.bf16 %v203_v27, %v200_v26  ;;  %v199_v31 = vld [vmem:[#allocation7 + $0x30] sm:$0xff]  ;;  %v202_v32 = vld [vmem:[#allocation7 + $0x48] sm:$0xff]  ;;  %v209_v35 = vld [vmem:[#allocation7 + $0x80] sm:$0xff]  ;;  %680 = vmatprep.mubr.msk.f32.mxu1 %vm891_vm5, %v889_v24  ;;  %v388_v23 = vadd.s32 8, %v982_v1  ;;  %v393_v27 = vand.u32 7, %v982_v1  ;;  %s892_s24 = smov [#allocation10]  }
  0x50   :  { %v83_v7 = vrot.slane %v77_v4, %v82_v2  ;;  %v90_v14 = vrot.slane %v77_v4, %v89_v3  ;;  %688 = vmatprep.subr.bf16.mxu0 %v687_v11  ;;  %v206_v34 = vld [vmem:[#allocation7 + $0x68] sm:$0xff]  ;;  %v701_v36 = vpack.c.bf16 %v202_v32, %v199_v31  ;;  %v205_v38 = vld [vmem:[#allocation7 + $0x60] sm:$0xff]  ;;  %v208_v39 = vld [vmem:[#allocation7 + $0x78] sm:$0xff]  ;;  %vm385_vm9 = vcmp.lt.s32.totalorder %v982_v1, 7  ;;  %s554_s25 = sshll.u32 %s892_s24, 4  ;;  %s555_s25 = int_to_ptr.vmem [resolvable:$true] %s554_s25 }
  0x51   :  { %v703_v37 = vpack.c.bf16 %v209_v35, %v206_v34  ;;  %v212_v40 = vld [vmem:[#allocation7 + $0x98] sm:$0xff]  ;;  %v215_v41 = vld [vmem:[#allocation7 + $0xb0] sm:$0xff]  ;;  %v705_v42 = vpack.c.bf16 %v208_v39, %v205_v38  ;;  %v214_v45 = vld [vmem:[#allocation7 + $0xa8] sm:$0xff]  ;;  %vm413_vm7 = vcmp.eq.s32.totalorder %v393_v27, 0  ;;  %vm417_vm10 = vcmp.eq.s32.totalorder %v393_v27, 7  ;;  %p856_p5 = scmp.lt.s32.totalorder %s555_s25, %s555_s25 }
  0x52   :  { %85 = vbcast.lane.b32.xlu0 %v83_v7, 256  ;;  %v707_v43 = vpack.c.bf16 %v215_v41, %v212_v40  ;;  %v211_v44 = vld [vmem:[#allocation7 + $0x90] sm:$0xff]  ;;  %v198_v48 = vld [vmem:[#allocation7 + $0x28] sm:$0xff]  ;;  %v201_v50 = vld [vmem:[#allocation7 + $0x40] sm:$0xff] }
  0x53   :  { %690 = vmatpush3.bf16.msra.mxu0 %v687_v11  ;;  %v709_v46 = vpack.c.bf16 %v214_v45, %v211_v44  ;;  %v195_v47 = vld [vmem:[#allocation7 + $0x10] sm:$0xff]  ;;  %v204_v51 = vld [vmem:[#allocation7 + $0x58] sm:$0xff]  ;;  %v210_v56 = vld [vmem:[#allocation7 + $0x88] sm:$0xff] }
  0x54   :  { %692 = vmatprep.subr.bf16.mxu0 %v691_v15  ;;  %v711_v49 = vpack.c.bf16 %v198_v48, %v195_v47  ;;  %v715_v53 = vpack.c.bf16 %v204_v51, %v201_v50  ;;  %v207_v55 = vld [vmem:[#allocation7 + $0x70] sm:$0xff]  ;;  %v213_v58 = vld [vmem:[#allocation7 + $0xa0] sm:$0xff]  ;;  %v216_v59 = vld [vmem:[#allocation7 + $0xb8] sm:$0xff] }
  0x55   :  { %v719_v57 = vpack.c.bf16 %v210_v56, %v207_v55  ;;  %v723_v60 = vpack.c.bf16 %v216_v59, %v213_v58  ;;  %v448_v61 = vld [vmem:[#allocation8] sm:$0xff]  ;;  %v449_v62 = vld [vmem:[#allocation8 + $0x8] sm:$0xff]  ;;  %v450_v2 = vld [vmem:[#allocation8 + $0x10] sm:$0xff] }
  0x56   :  { %92 = vbcast.lane.b32.xlu0 %v90_v14, 256  ;;  %v728_v0 = vpack.c.bf16 %v449_v62, %v448_v61  ;;  %v451_v3 = vld [vmem:[#allocation8 + $0x18] sm:$0xff]  ;;  %v452_v5 = vld [vmem:[#allocation8 + $0x20] sm:$0xff]  ;;  %v453_v6 = vld [vmem:[#allocation8 + $0x28] sm:$0xff] }
  0x57   :  { %694 = vmatpush3.bf16.msra.mxu0 %v691_v15  ;;  %v731_v4 = vpack.c.bf16 %v451_v3, %v450_v2  ;;  %v734_v7 = vpack.c.bf16 %v453_v6, %v452_v5  ;;  %v454_v8 = vld [vmem:[#allocation8 + $0x30] sm:$0xff]  ;;  %v455_v9 = vld [vmem:[#allocation8 + $0x38] sm:$0xff]  ;;  %v456_v11 = vld [vmem:[#allocation8 + $0x40] sm:$0xff] }
  0x58   :  { %624 = vmatprep.subr.msk.mxu0 %vm114_vm0, %v106_v16  ;;  %729 = vmatpush3.bf16.msra.mxu1 %v728_v0  ;;  %v737_v10 = vpack.c.bf16 %v455_v9, %v454_v8  ;;  %v457_v12 = vld [vmem:[#allocation8 + $0x48] sm:$0xff]  ;;  %v458_v14 = vld [vmem:[#allocation8 + $0x50] sm:$0xff]  ;;  %v459_v15 = vld [vmem:[#allocation8 + $0x58] sm:$0xff] }
  0x59   :  { %730 = vmatprep.subr.bf16.mxu1 %v890_v63  ;;  %v740_v13 = vpack.c.bf16 %v457_v12, %v456_v11  ;;  %v460_v17 = vld [vmem:[#allocation8 + $0x60] sm:$0xff]  ;;  %v461_v18 = vld [vmem:[#allocation8 + $0x68] sm:$0xff] }
  0x5a   :  { %v574_v1 = vld [vmem:[%s1022_s3] ss:$0 sm:$0xff]  ;;  %s851_s3 = scalar_lea.vmem %s555_s25, 32 }
  0x5b   :  { %625 = vmatpush3.msk.msra.mxu0 %vm114_vm0, %v106_v16  ;;  %v743_v16 = vpack.c.bf16 %v459_v15, %v458_v14  ;;  %v575_v3 = vld [vmem:[%s1024_s5] ss:$0 sm:$0xff]  ;;  %p852_p4 = scmp.ne.s32.totalorder %s555_s25, %s851_s3  ;;  %p857_p6 = scmp.lt.s32.totalorder %s851_s3, %s851_s3 }
  0x5c   :  { %696 = vmatprep.subr.bf16.mxu0 %v695_v19  ;;  %732 = vmatpush3.bf16.msra.mxu1 %v731_v4  ;;  %v746_v19 = vpack.c.bf16 %v461_v18, %v460_v17 }
  0x5d   :  { %733 = vmatprep.subr.bf16.mxu1 %v890_v63  ;;  %p858_p7 = por %p857_p6, %p856_p5 }
  0x5f   :  { %p859_p8 = pnand %p858_p7, %p852_p4 }
  0x60   :  { %735 = vmatpush3.bf16.msra.mxu1 %v734_v7 }
  0x61   :  { %736 = vmatprep.subr.bf16.mxu1 %v890_v63 }
  0x64   :  { %738 = vmatpush3.bf16.msra.mxu1 %v737_v10 }
  0x65   :  { %739 = vmatprep.subr.bf16.mxu1 %v890_v63 }
  0x68   :  { %741 = vmatpush3.bf16.msra.mxu1 %v740_v13 }
  0x69   :  { %742 = vmatprep.subr.bf16.mxu1 %v890_v63 }
  0x6c   :  { %744 = vmatpush3.bf16.msra.mxu1 %v743_v16 }
  0x6d   :  { %745 = vmatprep.subr.bf16.mxu1 %v890_v63 }
  0x70   :  { %747 = vmatpush3.bf16.msra.mxu1 %v746_v19 }
  0x71   :  { %748 = vmatprep.subr.bf16.mxu1 %v890_v63 }
  0xc4   :  { %v86_v21 = vpop.permute.xlu0 %85 }
  0xc5   :  { %vm94_vm2 = vcmp.eq.s32.totalorder %v79_v20, %v86_v21  ;;  %v463_v21 = vld [vmem:[#allocation8 + $0x78] sm:$0xff] }
  0xc6   :  { %v565_v25 = vsel %vm94_vm2, 1.0, %v889_v24 }
  0xc7   :  { %626 = vmatprep.mubr.msk.f32.mxu0 %vm107_vm1, %v565_v25 }
  0xc8   :  { %v93_v28 = vpop.permute.xlu0 %92 }
  0xc9   :  { %vm95_vm3 = vcmp.eq.s32.totalorder %v79_v20, %v93_v28  ;;  %v462_v20 = vld [vmem:[#allocation8 + $0x70] sm:$0xff]  ;;  %v400_v28 = vand.u32 7, %v388_v23 }
  0xca   :  { %v566_v33 = vsel %vm95_vm3, 1.0, %v889_v24  ;;  %v749_v22 = vpack.c.bf16 %v463_v21, %v462_v20 }
  0xcb   :  { %627 = vmatmul.mubr.msk.f32.vlgmr.msra.gmra.mrb[0].mxu0 %vm107_vm1, %v566_v33  ;;  %vm414_vm8 = vcmp.eq.s32.totalorder %v400_v28, 0  ;;  %vm418_vm11 = vcmp.eq.s32.totalorder %v400_v28, 7 }
  0xcc   :  { %698 = vmatpush1.bf16.msra.mxu0 %v697_v29  ;;  %288 = vmatprep.mubr.f32.mxu0 %v889_v24 }
  0xcd   :  { %700 = vmatprep.subr.bf16.mxu0 %v699_v30  ;;  %750 = vmatpush3.bf16.msra.mxu1 %v749_v22 }
  0xd0   :  { %702 = vmatpush1.bf16.msra.mxu0 %v701_v36 }
  0xd1   :  { %704 = vmatprep.subr.bf16.mxu0 %v703_v37 }
  0xd4   :  { %706 = vmatpush1.bf16.msra.mxu0 %v705_v42 }
  0xd5   :  { %708 = vmatprep.subr.bf16.mxu0 %v707_v43 }
  0xd8   :  { %710 = vmatpush1.bf16.msra.mxu0 %v709_v46 }
  0xd9   :  { %712 = vmatprep.subr.bf16.mxu0 %v711_v49 }
 0x19e   :  { %v628_v52 = vpop.f32.mrb[0].mxu0 }
 0x19f   :  { %v184_v54 = vpop.f32.mrb[1].mxu0 }
 0x1a0   :  { %570 = vmatmul.mubr.msk.f32.vlgmr.msra.gmra.mrb[2].mxu0 %vm217_vm4, %v184_v54 }
 0x1a1   :  { %714 = vmatpush3.bf16.msra.mxu0 %v711_v49  ;;  %294 = vmatprep.mubr.f32.mxu0 %v889_v24 }
 0x1a2   :  { %716 = vmatprep.subr.bf16.mxu0 %v715_v53 }
 0x1a4   :  { %571 = vmatmul.mubr.msk.f32.gmra.mrb[4].mxu0 %vm217_vm4, %v628_v52 }
 0x1a5   :  { %718 = vmatpush3.bf16.msra.mxu0 %v715_v53  ;;  %645 = vmatprep.mubr.msk.f32.mxu0 %vm217_vm4, %v184_v54 }
 0x1a6   :  { %720 = vmatprep.subr.bf16.mxu0 %v719_v57 }
 0x1a9   :  { %722 = vmatpush3.bf16.msra.mxu0 %v719_v57 }
 0x1aa   :  { %724 = vmatprep.subr.bf16.mxu0 %v723_v60 }
 0x1ad   :  { %726 = vmatpush3.bf16.msra.mxu0 %v723_v60 }
 0x1b0   :  { %646 = vmatmul.mubr.msk.f32.vlgmr.msra.gmra.mrb[6].mxu0 %vm217_vm4, %v628_v52 }
 0x273   :  { %v290_v25 = vpop.f32.mrb[2].mxu0 }
 0x274   :  { %v292_v26 = vpop.f32.mrb[3].mxu0  ;;  %v376_v24 = vrot.slane %v290_v25, 7 }
 0x277   :  { %v296_v29 = vpop.f32.mrb[4].mxu0 }
 0x278   :  { %v377_v30 = vrot.slane %v296_v29, 7  ;;  %v298_v31 = vpop.f32.mrb[5].mxu0 }
 0x27a   :  { %v381_v32 = vsel %vm380_vm6, %v376_v24, %v377_v30  ;;  %v382_v33 = vsel %vm380_vm6, %v377_v30, %v376_v24 }
 0x27b   :  { %v415_v34 = vsel %vm413_vm7, 0.0, %v382_v33  ;;  %v416_v35 = vsel %vm414_vm8, 0.0, %v381_v32 }
 0x27c   :  { %v422_v36 = vadd.f32 %v416_v35, %v298_v31  ;;  %v421_v37 = vadd.f32 %v415_v34, %v292_v26 }
 0x283   :  { %v647_v38 = vpop.f32.mrb[6].mxu0 }
 0x284   :  { %v384_v39 = vrot.slane %v647_v38, 1  ;;  %v367_v40 = vpop.f32.mrb[7].mxu0 }
 0x285   :  { %v383_v41 = vrot.slane %v367_v40, 1 }
 0x287   :  { %v386_v42 = vsel %vm385_vm9, %v383_v41, %v384_v39  ;;  %v387_v43 = vsel %vm385_vm9, %v384_v39, %v383_v41 }
 0x288   :  { %v419_v44 = vsel %vm417_vm10, 0.0, %v386_v42  ;;  %v420_v45 = vsel %vm418_vm11, 0.0, %v387_v43 }
 0x289   :  { %v423_v46 = vadd.f32 %v421_v37, %v419_v44  ;;  %v424_v47 = vadd.f32 %v422_v36, %v420_v45 }
 0x28b   :  { %v425_v48 = vrot.slane %v423_v46, 4  ;;  %v431_v49 = vrot.slane %v424_v47, 4 }
 0x28d   :  { %v426_v50 = vmax.f32 %v423_v46, %v425_v48  ;;  %v432_v51 = vmax.f32 %v424_v47, %v431_v49 }
 0x28f   :  { %v427_v52 = vrot.slane %v426_v50, 2  ;;  %v433_v53 = vrot.slane %v432_v51, 2 }
 0x291   :  { %v428_v54 = vmax.f32 %v426_v50, %v427_v52  ;;  %v434_v55 = vmax.f32 %v432_v51, %v433_v53 }
 0x293   :  { %v429_v56 = vrot.slane %v428_v54, 1  ;;  %v435_v57 = vrot.slane %v434_v55, 1 }
 0x295   :  { %v430_v58 = vmax.f32 %v428_v54, %v429_v56  ;;  %v436_v59 = vmax.f32 %v434_v55, %v435_v57 }
 0x297   :  { %v444_v60 = vadd.f32 %v574_v1, %v430_v58  ;;  %v445_v61 = vadd.f32 %v574_v1, %v436_v59 }
 0x299   :  { %v447_v62 = vmax.f32 %v445_v61, 0.0  ;;  %v446_v63 = vmax.f32 %v444_v60, 0.0 }
 0x29b   :  { %v473_v0 = vrot.slane %v447_v62, 7 }
 0x29d   :  { %v475_v2 = vsel %vm474_vm12, %v473_v0, %v446_v63 }
 0x29e   :  { %681 = vmatmul.mubr.f32.vlgmr.msra.gmra.mrb[0].mxu1 %v475_v2 }
 0x371   :  { %v543_v4 = vpop.f32.mrb[0].mxu1 }
 0x372   :  { %v544_v5 = vadd.f32 %v575_v3, %v543_v4  ;;  %v682_v6 = vpop.f32.mrb[1].mxu1 }
 0x374   :  { %547 = vst [vmem:[#allocation10] sm:$0x3] %v544_v5 }
 0x375   :  { %862 = shalt.err (!%p859_p8)
}
 0x376   :  { %s863_s28 = scalar_lea.hbm %s1025_s6, 32 }
 0x377   :  { %p864_p9 = scmp.ne.s32.totalorder %s1025_s6, %s863_s28  ;;  %p867_p10 = scmp.lt.u32.totalorder %s863_s28, %s1025_s6 }
 0x379   :  { %p869_p11 = pnand %p867_p10, %p864_p9 }
 0x37b   :  { %872 = shalt.err (!%p869_p11)
}
 0x37c   :  { %557 = dma.vmem_to_hbm [thread:$0]  %s555_s25, 32, %s1025_s6, [#allocation4]  }
 0x37d   :  { %879 = dma.done.wait [#allocation4], 32  }
 0x37e   :  { %880 = vsyncadd [#allocation4], 4294967264 }
 0x37f   :  { %561 = vsyncpa [#allocation3], 1 }
 0x380   :  { %562 = vsyncpa [#allocation6], 1 }
 0x381   :  { %563 = vsyncpa [#allocation9], 1 }
 0x382   :  { %564 = vsyncpa [#allocation4], 1 }

</bundles_post_ra>
